<compile_context>
chip_gen: v6e
topology: v6e:2x2x1
jax: 0.10.0
libtpu: 0.0.40
codegen_flags: <defaults>
</compile_context>

<pallas_src>
import jax
import jax.numpy as jnp
from jax.experimental import pallas as pl
from jax.experimental.pallas import tpu as pltpu

# ----------------------------- configuration -------------------------------
B = 2            # batch size
CIN = 4          # input channels
H = W = 16       # spatial
HW = H * W       # 256
S = 2            # split_factor == loop_factor
CMID = 32        # surrogate backbone hidden channels
C = 10           # num_classes
KP = 3 * 3 * CIN # im2col patch size (3x3 conv) = 36
COT_WEIGHT = 0.5 # args.cot_weight (no warm-up)


# ------------------------------ glue helpers --------------------------------
def im2col_3x3_same(x_nhwc):
    """[B, H, W, Cin] -> [B, H*W, 9*Cin] patches for a 3x3 SAME conv."""
    b, h, w, cin = x_nhwc.shape
    xp = jnp.pad(x_nhwc, ((0, 0), (1, 1), (1, 1), (0, 0)))
    cols = []
    for dh in range(3):
        for dw in range(3):
            cols.append(xp[:, dh:dh + h, dw:dw + w, :])
    patches = jnp.concatenate(cols, axis=-1)          # [B, H, W, 9*Cin]
    return patches.reshape(b, h * w, 9 * cin)


# ------------------------ single fused Pallas kernel -------------------------
def splitnet_kernel(patches_ref, wc_ref, bc_ref, wf_ref, bf_ref, onehot_ref,
                    logits_ref, ens_ref, loss_ref):
    # patches_ref: (B*HW, KP)      bf16   im2col patches, batch flattened
    # wc_ref:      (KP, S*CMID)    bf16   conv weights of all S models packed on lanes
    # bc_ref:      (1, S*CMID)     f32
    # wf_ref:      (S, CMID, C)    f32    per-model classifier weights
    # bf_ref:      (S, 1, C)       f32
    # onehot_ref:  (B, C)          f32
    # logits_ref:  (S, B, C)       f32    per-model logits (VMEM)
    # ens_ref:     (B, C)          f32    ensemble logits (VMEM)
    # loss_ref:    (2,)            f32    [ce_loss, cot_loss] (SMEM scalars)

    # 1) conv-as-matmul for all S sub-models at once: bf16 operands, f32 accumulation.
    h = jnp.dot(patches_ref[...], wc_ref[...],
                preferred_element_type=jnp.float32)            # (B*HW, S*CMID)
    h = jnp.maximum(h + bc_ref[...], 0.0)                      # bias + ReLU in f32

    # 2) global average pool as an MXU contraction (per-batch segment mean),
    #    instead of a cross-sublane jnp.mean reduction.
    row = jax.lax.broadcasted_iota(jnp.int32, (B, B * HW), 0)
    col = jax.lax.broadcasted_iota(jnp.int32, (B, B * HW), 1)
    in_seg = (col >= row * HW) & (col < (row + 1) * HW)
    pool = jnp.where(in_seg, jnp.float32(1.0 / HW), jnp.float32(0.0))
    feat = jnp.dot(pool, h, preferred_element_type=jnp.float32)  # (B, S*CMID)

    # 3) per-model classifier + CE + JS-divergence head (static unroll, S=2).
    onehot = onehot_ref[...]                                    # (B, C)
    ce = jnp.float32(0.0)
    h_sep_sum = jnp.float32(0.0)
    ens_sum = jnp.zeros((B, C), jnp.float32)
    p_sum = jnp.zeros((B, C), jnp.float32)

    for s in range(S):
        feat_s = feat[:, s * CMID:(s + 1) * CMID]               # (B, CMID)
        logits_s = (jnp.dot(feat_s, wf_ref[s],
                            preferred_element_type=jnp.float32)
                    + bf_ref[s])                                # (B, C)
        logits_ref[s] = logits_s.astype(logits_ref.dtype)

        # stable log-softmax over classes
        m = jnp.max(logits_s, axis=-1, keepdims=True)
        z = logits_s - m
        lse = jnp.log(jnp.sum(jnp.exp(z), axis=-1, keepdims=True))
        logp = z - lse
        p = jnp.exp(logp)

        ce = ce + jnp.mean(jnp.sum(-onehot * logp, axis=-1, keepdims=True))
        h_sep_sum = h_sep_sum + jnp.mean(jnp.sum(-p * logp, axis=-1, keepdims=True))
        ens_sum = ens_sum + logits_s
        p_sum = p_sum + p

    ens_ref[...] = (ens_sum * (1.0 / S)).astype(ens_ref.dtype)

    p_mean = p_sum * (1.0 / S)
    h_mean = jnp.mean(jnp.sum(-p_mean * jnp.log(p_mean), axis=-1, keepdims=True))
    h_sep = h_sep_sum * (1.0 / S)

    loss_ref[0] = ce
    loss_ref[1] = COT_WEIGHT * (h_mean - h_sep)


def run_splitnet(patches_bf16, wc_packed_bf16, bc_packed, wf, bf, onehot):
    return pl.pallas_call(
        splitnet_kernel,
        out_shape=(
            jax.ShapeDtypeStruct((S, B, C), jnp.float32),   # per-model logits
            jax.ShapeDtypeStruct((B, C), jnp.float32),      # ensemble logits
            jax.ShapeDtypeStruct((2,), jnp.float32),        # [ce, cot] scalars
        ),
        grid=(1,),
        in_specs=[
            pl.BlockSpec((B * HW, KP), lambda i: (0, 0)),
            pl.BlockSpec((KP, S * CMID), lambda i: (0, 0)),
            pl.BlockSpec((1, S * CMID), lambda i: (0, 0)),
            pl.BlockSpec((S, CMID, C), lambda i: (0, 0, 0)),
            pl.BlockSpec((S, 1, C), lambda i: (0, 0, 0)),
            pl.BlockSpec((B, C), lambda i: (0, 0)),
        ],
        out_specs=(
            pl.BlockSpec((S, B, C), lambda i: (0, 0, 0)),
            pl.BlockSpec((B, C), lambda i: (0, 0)),
            pl.BlockSpec(memory_space=pltpu.MemorySpace.SMEM),
        ),
        compiler_params=pltpu.CompilerParams(
            dimension_semantics=("arbitrary",)),
    )(patches_bf16, wc_packed_bf16, bc_packed, wf, bf, onehot)


# ------------------------------ SplitNet forward -----------------------------
@jax.jit
def splitnet_forward(x_nchw, target, wc, bc, wf, bf):
    """Train-mode SplitNet.forward -> (ensemble_output, outputs, ce_loss, cot_loss)."""
    x_nhwc = jnp.transpose(x_nchw, (0, 2, 3, 1))                   # NCHW -> NHWC (glue)
    patches = im2col_3x3_same(x_nhwc).reshape(B * HW, KP)          # (512, 36)

    # pack the S sub-models along the lane (channel) axis
    wc_packed = jnp.transpose(wc, (1, 0, 2)).reshape(KP, S * CMID)  # (36, 64)
    bc_packed = jnp.transpose(bc, (1, 0, 2)).reshape(1, S * CMID)   # (1, 64)
    onehot = jax.nn.one_hot(target, C, dtype=jnp.float32)           # (B, C)

    logits, ensemble, losses = run_splitnet(
        patches.astype(jnp.bfloat16), wc_packed.astype(jnp.bfloat16),
        bc_packed, wf, bf, onehot)
    return ensemble, logits, losses[0], losses[1]


# ------------------------------ pure-JAX reference ---------------------------
def reference_forward(x_nchw, target, wc, bc, wf, bf):
    x_nhwc = jnp.transpose(x_nchw, (0, 2, 3, 1))
    patches = im2col_3x3_same(x_nhwc)                                   # [B,HW,KP]
    # same bf16 conv operands as the kernel (f32 accumulation)
    h = jnp.einsum('bpk,skc->sbpc', patches.astype(jnp.bfloat16),
                   wc.astype(jnp.bfloat16),
                   preferred_element_type=jnp.float32)                  # [S,B,HW,CMID]
    h = jnp.maximum(h + bc[:, None, :, :], 0.0)
    feat = jnp.mean(h, axis=2)                                          # [S,B,CMID]
    logits = jnp.einsum('sbm,smc->sbc', feat, wf,
                        preferred_element_type=jnp.float32) + bf        # [S,B,C]

    logp = jax.nn.log_softmax(logits, axis=-1)
    p = jnp.exp(logp)
    onehot = jax.nn.one_hot(target, C, dtype=jnp.float32)
    ce = jnp.sum(jnp.mean(-jnp.sum(onehot[None] * logp, axis=-1), axis=-1))
    ensemble = jnp.mean(logits, axis=0)
    p_mean = jnp.mean(p, axis=0)
    h_mean = jnp.mean(jnp.sum(-p_mean * jnp.log(p_mean), axis=-1))
    h_sep = jnp.mean(jnp.sum(-p * logp, axis=-1))
    cot = COT_WEIGHT * (h_mean - h_sep)
    return ensemble, logits, ce, cot


# ----------------------------------- main ------------------------------------
if __name__ == "__main__":
    key = jax.random.PRNGKey(0)
    kx, kt, k1, k2, k3, k4 = jax.random.split(key, 6)

    x = jax.random.normal(kx, (B, CIN, H, W), dtype=jnp.float32)   # NCHW like PyTorch
    target = jax.random.randint(kt, (B,), 0, C)

    # per-split-model parameters (identical shapes across the S models)
    wc = 0.1 * jax.random.normal(k1, (S, KP, CMID), dtype=jnp.float32)
    bc = 0.1 * jax.random.normal(k2, (S, 1, CMID), dtype=jnp.float32)
    wf = 0.1 * jax.random.normal(k3, (S, CMID, C), dtype=jnp.float32)
    bf = 0.1 * jax.random.normal(k4, (S, 1, C), dtype=jnp.float32)

    ens, outs, ce, cot = splitnet_forward(x, target, wc, bc, wf, bf)
    jax.block_until_ready((ens, outs, ce, cot))

    r_ens, r_outs, r_ce, r_cot = reference_forward(x, target, wc, bc, wf, bf)
    assert ens.shape == (B, C) and outs.shape == (S, B, C)
    assert jnp.allclose(ens, r_ens, atol=2e-3, rtol=2e-3)
    assert jnp.allclose(outs, r_outs, atol=2e-3, rtol=2e-3)
    assert jnp.allclose(ce, r_ce, atol=2e-3, rtol=2e-3)
    assert jnp.allclose(cot, r_cot, atol=2e-3, rtol=2e-3)

    print("KERNEL_OK")
</pallas_src>

<mosaic_0001>
module attributes {stable_mosaic.version = 11 : i64} {
  func.func @splitnet_kernel(%arg0: i32, %arg1: memref<512x36xbf16, #tpu.memory_space<vmem>>, %arg2: memref<36x64xbf16, #tpu.memory_space<vmem>>, %arg3: memref<1x64xf32, #tpu.memory_space<vmem>>, %arg4: memref<2x32x10xf32, #tpu.memory_space<vmem>>, %arg5: memref<2x1x10xf32, #tpu.memory_space<vmem>>, %arg6: memref<2x10xf32, #tpu.memory_space<vmem>>, %arg7: memref<2x2x10xf32, #tpu.memory_space<vmem>>, %arg8: memref<2x10xf32, #tpu.memory_space<vmem>>, %arg9: memref<2xf32, #tpu.memory_space<smem>>) attributes {dimension_semantics = [#tpu.dimension_semantics<arbitrary>], iteration_bounds = array<i64: 1>, scalar_prefetch = 0 : i64, scratch_operands = 0 : i64, tpu.core_type = #tpu.core_type<tc>, window_params = [{pipeline_mode = #tpu.pipeline_mode<synchronous>, transform_indices = @transform_0, window_bounds = array<i64: 512, 36>}, {pipeline_mode = #tpu.pipeline_mode<synchronous>, transform_indices = @transform_1, window_bounds = array<i64: 36, 64>}, {pipeline_mode = #tpu.pipeline_mode<synchronous>, transform_indices = @transform_2, window_bounds = array<i64: 1, 64>}, {pipeline_mode = #tpu.pipeline_mode<synchronous>, transform_indices = @transform_3, window_bounds = array<i64: 2, 32, 10>}, {pipeline_mode = #tpu.pipeline_mode<synchronous>, transform_indices = @transform_4, window_bounds = array<i64: 2, 1, 10>}, {pipeline_mode = #tpu.pipeline_mode<synchronous>, transform_indices = @transform_5, window_bounds = array<i64: 2, 10>}, {pipeline_mode = #tpu.pipeline_mode<synchronous>, transform_indices = @transform_6, window_bounds = array<i64: 2, 2, 10>}, {pipeline_mode = #tpu.pipeline_mode<synchronous>, transform_indices = @transform_7, window_bounds = array<i64: 2, 10>}, {transform_indices = @transform_8, window_bounds = array<i64: 2>}]} {
    %c0 = arith.constant 0 : index
    %c0_0 = arith.constant 0 : index
    %0 = vector.load %arg1[%c0, %c0_0] : memref<512x36xbf16, #tpu.memory_space<vmem>>, vector<512x36xbf16>
    %c0_1 = arith.constant 0 : index
    %c0_2 = arith.constant 0 : index
    %1 = vector.load %arg2[%c0_1, %c0_2] : memref<36x64xbf16, #tpu.memory_space<vmem>>, vector<36x64xbf16>
    %cst = arith.constant dense<0.000000e+00> : vector<512x64xf32>
    %2 = tpu.matmul %0, %1, %cst {dimension_numbers = #tpu.dot_dimension_numbers<[1], [0], [0], [1], [0, 0, 1, 1], [], []>} : vector<512x36xbf16>, vector<36x64xbf16>, vector<512x64xf32> -> vector<512x64xf32>
    %c0_3 = arith.constant 0 : index
    %c0_4 = arith.constant 0 : index
    %3 = vector.load %arg3[%c0_3, %c0_4] : memref<1x64xf32, #tpu.memory_space<vmem>>, vector<1x64xf32>
    %4 = vector.broadcast %3 : vector<1x64xf32> to vector<512x64xf32>
    %5 = arith.addf %2, %4 : vector<512x64xf32>
    %cst_5 = arith.constant 0.000000e+00 : f32
    %6 = vector.broadcast %cst_5 : f32 to vector<512x64xf32>
    %7 = arith.maximumf %5, %6 : vector<512x64xf32>
    %8 = tpu.iota {dimensions = array<i32: 0>} : vector<2x512xi32>
    %9 = tpu.iota {dimensions = array<i32: 1>} : vector<2x512xi32>
    %c256_i32 = arith.constant 256 : i32
    %10 = vector.broadcast %c256_i32 : i32 to vector<2x512xi32>
    %11 = arith.muli %8, %10 : vector<2x512xi32>
    %12 = arith.cmpi sge, %9, %11 : vector<2x512xi32>
    %c1_i32 = arith.constant 1 : i32
    %13 = vector.broadcast %c1_i32 : i32 to vector<2x512xi32>
    %14 = arith.addi %8, %13 : vector<2x512xi32>
    %c256_i32_6 = arith.constant 256 : i32
    %15 = vector.broadcast %c256_i32_6 : i32 to vector<2x512xi32>
    %16 = arith.muli %14, %15 : vector<2x512xi32>
    %17 = arith.cmpi slt, %9, %16 : vector<2x512xi32>
    %18 = arith.andi %12, %17 : vector<2x512xi1>
    %cst_7 = arith.constant 3.906250e-03 : f32
    %cst_8 = arith.constant 0.000000e+00 : f32
    %19 = vector.broadcast %cst_7 : f32 to vector<2x512xf32>
    %20 = vector.broadcast %cst_8 : f32 to vector<2x512xf32>
    %21 = arith.select %18, %19, %20 : vector<2x512xi1>, vector<2x512xf32>
    %cst_9 = arith.constant dense<0.000000e+00> : vector<2x64xf32>
    %22 = tpu.matmul %21, %7, %cst_9 {dimension_numbers = #tpu.dot_dimension_numbers<[1], [0], [0], [1], [0, 0, 1, 1], [], []>} : vector<2x512xf32>, vector<512x64xf32>, vector<2x64xf32> -> vector<2x64xf32>
    %c0_10 = arith.constant 0 : index
    %c0_11 = arith.constant 0 : index
    %23 = vector.load %arg6[%c0_10, %c0_11] : memref<2x10xf32, #tpu.memory_space<vmem>>, vector<2x10xf32>
    %cst_12 = arith.constant 0.000000e+00 : f32
    %24 = vector.broadcast %cst_12 : f32 to vector<2x10xf32>
    %cst_13 = arith.constant 0.000000e+00 : f32
    %25 = vector.broadcast %cst_13 : f32 to vector<2x10xf32>
    %26 = vector.extract_strided_slice %22 {offsets = [0, 0], sizes = [2, 32], strides = [1, 1]} : vector<2x64xf32> to vector<2x32xf32>
    %c0_14 = arith.constant 0 : index
    %c0_15 = arith.constant 0 : index
    %c0_16 = arith.constant 0 : index
    %27 = vector.load %arg4[%c0_14, %c0_15, %c0_16] : memref<2x32x10xf32, #tpu.memory_space<vmem>>, vector<1x32x10xf32>
    %28 = vector.shape_cast %27 : vector<1x32x10xf32> to vector<32x10xf32>
    %cst_17 = arith.constant dense<0.000000e+00> : vector<2x10xf32>
    %29 = tpu.matmul %26, %28, %cst_17 {dimension_numbers = #tpu.dot_dimension_numbers<[1], [0], [0], [1], [0, 0, 1, 1], [], []>} : vector<2x32xf32>, vector<32x10xf32>, vector<2x10xf32> -> vector<2x10xf32>
    %c0_18 = arith.constant 0 : index
    %c0_19 = arith.constant 0 : index
    %c0_20 = arith.constant 0 : index
    %30 = vector.load %arg5[%c0_18, %c0_19, %c0_20] : memref<2x1x10xf32, #tpu.memory_space<vmem>>, vector<1x1x10xf32>
    %31 = vector.shape_cast %30 : vector<1x1x10xf32> to vector<1x10xf32>
    %32 = vector.broadcast %31 : vector<1x10xf32> to vector<2x10xf32>
    %33 = arith.addf %29, %32 : vector<2x10xf32>
    %c0_21 = arith.constant 0 : index
    %c0_22 = arith.constant 0 : index
    %c0_23 = arith.constant 0 : index
    %34 = vector.load %arg7[%c0_21, %c0_22, %c0_23] : memref<2x2x10xf32, #tpu.memory_space<vmem>>, vector<1x2x10xf32>
    %35 = vector.shape_cast %34 : vector<1x2x10xf32> to vector<2x10xf32>
    %36 = vector.shape_cast %33 : vector<2x10xf32> to vector<1x2x10xf32>
    tpu.vector_store %arg7[%c0_21, %c0_22, %c0_23], %36 {strides = array<i32>} : memref<2x2x10xf32, #tpu.memory_space<vmem>>, vector<1x2x10xf32>,
    %cst_24 = arith.constant dense<0xFF800000> : vector<2xf32>
    %37 = vector.multi_reduction <maximumf>, %33, %cst_24 [1] : vector<2x10xf32> to vector<2xf32>
    %38 = vector.shape_cast %37 : vector<2xf32> to vector<2x1xf32>
    %39 = vector.broadcast %38 : vector<2x1xf32> to vector<2x10xf32>
    %40 = arith.subf %33, %39 : vector<2x10xf32>
    %41 = math.exp %40 : vector<2x10xf32>
    %cst_25 = arith.constant dense<0.000000e+00> : vector<2xf32>
    %42 = vector.multi_reduction <add>, %41, %cst_25 [1] : vector<2x10xf32> to vector<2xf32>
    %43 = vector.shape_cast %42 : vector<2xf32> to vector<2x1xf32>
    %44 = math.log %43 : vector<2x1xf32>
    %45 = vector.broadcast %44 : vector<2x1xf32> to vector<2x10xf32>
    %46 = arith.subf %40, %45 : vector<2x10xf32>
    %47 = math.exp %46 : vector<2x10xf32>
    %cst_26 = arith.constant 0.000000e+00 : f32
    %48 = vector.broadcast %cst_26 : f32 to vector<2x10xf32>
    %49 = arith.subf %48, %23 : vector<2x10xf32>
    %50 = arith.mulf %49, %46 : vector<2x10xf32>
    %cst_27 = arith.constant dense<0.000000e+00> : vector<2xf32>
    %51 = vector.multi_reduction <add>, %50, %cst_27 [1] : vector<2x10xf32> to vector<2xf32>
    %52 = vector.shape_cast %51 : vector<2xf32> to vector<2x1xf32>
    %53 = vector.shape_cast %52 : vector<2x1xf32> to vector<1x2x1xf32>
    %cst_28 = arith.constant dense<0.000000e+00> : vector<1xf32>
    %54 = vector.multi_reduction <add>, %53, %cst_28 [1, 2] : vector<1x2x1xf32> to vector<1xf32>
    %55 = vector.shape_cast %54 : vector<1xf32> to vector<1x1x1xf32>
    %56 = vector.extract %55[0, 0, 0] : f32 from vector<1x1x1xf32>
    %cst_29 = arith.constant 2.000000e+00 : f32
    %57 = arith.divf %56, %cst_29 : f32
    %cst_30 = arith.constant 0.000000e+00 : f32
    %58 = arith.addf %cst_30, %57 : f32
    %cst_31 = arith.constant 0.000000e+00 : f32
    %59 = vector.broadcast %cst_31 : f32 to vector<2x10xf32>
    %60 = arith.subf %59, %47 : vector<2x10xf32>
    %61 = arith.mulf %60, %46 : vector<2x10xf32>
    %cst_32 = arith.constant dense<0.000000e+00> : vector<2xf32>
    %62 = vector.multi_reduction <add>, %61, %cst_32 [1] : vector<2x10xf32> to vector<2xf32>
    %63 = vector.shape_cast %62 : vector<2xf32> to vector<2x1xf32>
    %64 = vector.shape_cast %63 : vector<2x1xf32> to vector<1x2x1xf32>
    %cst_33 = arith.constant dense<0.000000e+00> : vector<1xf32>
    %65 = vector.multi_reduction <add>, %64, %cst_33 [1, 2] : vector<1x2x1xf32> to vector<1xf32>
    %66 = vector.shape_cast %65 : vector<1xf32> to vector<1x1x1xf32>
    %67 = vector.extract %66[0, 0, 0] : f32 from vector<1x1x1xf32>
    %cst_34 = arith.constant 2.000000e+00 : f32
    %68 = arith.divf %67, %cst_34 : f32
    %cst_35 = arith.constant 0.000000e+00 : f32
    %69 = arith.addf %cst_35, %68 : f32
    %70 = arith.addf %24, %33 : vector<2x10xf32>
    %71 = arith.addf %25, %47 : vector<2x10xf32>
    %72 = vector.extract_strided_slice %22 {offsets = [0, 32], sizes = [2, 32], strides = [1, 1]} : vector<2x64xf32> to vector<2x32xf32>
    %c1 = arith.constant 1 : index
    %c0_36 = arith.constant 0 : index
    %c0_37 = arith.constant 0 : index
    %73 = vector.load %arg4[%c1, %c0_36, %c0_37] : memref<2x32x10xf32, #tpu.memory_space<vmem>>, vector<1x32x10xf32>
    %74 = vector.shape_cast %73 : vector<1x32x10xf32> to vector<32x10xf32>
    %cst_38 = arith.constant dense<0.000000e+00> : vector<2x10xf32>
    %75 = tpu.matmul %72, %74, %cst_38 {dimension_numbers = #tpu.dot_dimension_numbers<[1], [0], [0], [1], [0, 0, 1, 1], [], []>} : vector<2x32xf32>, vector<32x10xf32>, vector<2x10xf32> -> vector<2x10xf32>
    %c1_39 = arith.constant 1 : index
    %c0_40 = arith.constant 0 : index
    %c0_41 = arith.constant 0 : index
    %76 = vector.load %arg5[%c1_39, %c0_40, %c0_41] : memref<2x1x10xf32, #tpu.memory_space<vmem>>, vector<1x1x10xf32>
    %77 = vector.shape_cast %76 : vector<1x1x10xf32> to vector<1x10xf32>
    %78 = vector.broadcast %77 : vector<1x10xf32> to vector<2x10xf32>
    %79 = arith.addf %75, %78 : vector<2x10xf32>
    %c1_42 = arith.constant 1 : index
    %c0_43 = arith.constant 0 : index
    %c0_44 = arith.constant 0 : index
    %80 = vector.load %arg7[%c1_42, %c0_43, %c0_44] : memref<2x2x10xf32, #tpu.memory_space<vmem>>, vector<1x2x10xf32>
    %81 = vector.shape_cast %80 : vector<1x2x10xf32> to vector<2x10xf32>
    %82 = vector.shape_cast %79 : vector<2x10xf32> to vector<1x2x10xf32>
    tpu.vector_store %arg7[%c1_42, %c0_43, %c0_44], %82 {strides = array<i32>} : memref<2x2x10xf32, #tpu.memory_space<vmem>>, vector<1x2x10xf32>,
    %cst_45 = arith.constant dense<0xFF800000> : vector<2xf32>
    %83 = vector.multi_reduction <maximumf>, %79, %cst_45 [1] : vector<2x10xf32> to vector<2xf32>
    %84 = vector.shape_cast %83 : vector<2xf32> to vector<2x1xf32>
    %85 = vector.broadcast %84 : vector<2x1xf32> to vector<2x10xf32>
    %86 = arith.subf %79, %85 : vector<2x10xf32>
    %87 = math.exp %86 : vector<2x10xf32>
    %cst_46 = arith.constant dense<0.000000e+00> : vector<2xf32>
    %88 = vector.multi_reduction <add>, %87, %cst_46 [1] : vector<2x10xf32> to vector<2xf32>
    %89 = vector.shape_cast %88 : vector<2xf32> to vector<2x1xf32>
    %90 = math.log %89 : vector<2x1xf32>
    %91 = vector.broadcast %90 : vector<2x1xf32> to vector<2x10xf32>
    %92 = arith.subf %86, %91 : vector<2x10xf32>
    %93 = math.exp %92 : vector<2x10xf32>
    %cst_47 = arith.constant 0.000000e+00 : f32
    %94 = vector.broadcast %cst_47 : f32 to vector<2x10xf32>
    %95 = arith.subf %94, %23 : vector<2x10xf32>
    %96 = arith.mulf %95, %92 : vector<2x10xf32>
    %cst_48 = arith.constant dense<0.000000e+00> : vector<2xf32>
    %97 = vector.multi_reduction <add>, %96, %cst_48 [1] : vector<2x10xf32> to vector<2xf32>
    %98 = vector.shape_cast %97 : vector<2xf32> to vector<2x1xf32>
    %99 = vector.shape_cast %98 : vector<2x1xf32> to vector<1x2x1xf32>
    %cst_49 = arith.constant dense<0.000000e+00> : vector<1xf32>
    %100 = vector.multi_reduction <add>, %99, %cst_49 [1, 2] : vector<1x2x1xf32> to vector<1xf32>
    %101 = vector.shape_cast %100 : vector<1xf32> to vector<1x1x1xf32>
    %102 = vector.extract %101[0, 0, 0] : f32 from vector<1x1x1xf32>
    %cst_50 = arith.constant 2.000000e+00 : f32
    %103 = arith.divf %102, %cst_50 : f32
    %104 = arith.addf %58, %103 : f32
    %cst_51 = arith.constant 0.000000e+00 : f32
    %105 = vector.broadcast %cst_51 : f32 to vector<2x10xf32>
    %106 = arith.subf %105, %93 : vector<2x10xf32>
    %107 = arith.mulf %106, %92 : vector<2x10xf32>
    %cst_52 = arith.constant dense<0.000000e+00> : vector<2xf32>
    %108 = vector.multi_reduction <add>, %107, %cst_52 [1] : vector<2x10xf32> to vector<2xf32>
    %109 = vector.shape_cast %108 : vector<2xf32> to vector<2x1xf32>
    %110 = vector.shape_cast %109 : vector<2x1xf32> to vector<1x2x1xf32>
    %cst_53 = arith.constant dense<0.000000e+00> : vector<1xf32>
    %111 = vector.multi_reduction <add>, %110, %cst_53 [1, 2] : vector<1x2x1xf32> to vector<1xf32>
    %112 = vector.shape_cast %111 : vector<1xf32> to vector<1x1x1xf32>
    %113 = vector.extract %112[0, 0, 0] : f32 from vector<1x1x1xf32>
    %cst_54 = arith.constant 2.000000e+00 : f32
    %114 = arith.divf %113, %cst_54 : f32
    %115 = arith.addf %69, %114 : f32
    %116 = arith.addf %70, %79 : vector<2x10xf32>
    %117 = arith.addf %71, %93 : vector<2x10xf32>
    %cst_55 = arith.constant 5.000000e-01 : f32
    %118 = vector.broadcast %cst_55 : f32 to vector<2x10xf32>
    %119 = arith.mulf %116, %118 : vector<2x10xf32>
    %c0_56 = arith.constant 0 : index
    %c0_57 = arith.constant 0 : index
    %120 = vector.load %arg8[%c0_56, %c0_57] : memref<2x10xf32, #tpu.memory_space<vmem>>, vector<2x10xf32>
    tpu.vector_store %arg8[%c0_56, %c0_57], %119 {strides = array<i32>} : memref<2x10xf32, #tpu.memory_space<vmem>>, vector<2x10xf32>,
    %cst_58 = arith.constant 5.000000e-01 : f32
    %121 = vector.broadcast %cst_58 : f32 to vector<2x10xf32>
    %122 = arith.mulf %117, %121 : vector<2x10xf32>
    %cst_59 = arith.constant 0.000000e+00 : f32
    %123 = vector.broadcast %cst_59 : f32 to vector<2x10xf32>
    %124 = arith.subf %123, %122 : vector<2x10xf32>
    %125 = math.log %122 : vector<2x10xf32>
    %126 = arith.mulf %124, %125 : vector<2x10xf32>
    %cst_60 = arith.constant dense<0.000000e+00> : vector<2xf32>
    %127 = vector.multi_reduction <add>, %126, %cst_60 [1] : vector<2x10xf32> to vector<2xf32>
    %128 = vector.shape_cast %127 : vector<2xf32> to vector<2x1xf32>
    %129 = vector.shape_cast %128 : vector<2x1xf32> to vector<1x2x1xf32>
    %cst_61 = arith.constant dense<0.000000e+00> : vector<1xf32>
    %130 = vector.multi_reduction <add>, %129, %cst_61 [1, 2] : vector<1x2x1xf32> to vector<1xf32>
    %131 = vector.shape_cast %130 : vector<1xf32> to vector<1x1x1xf32>
    %132 = vector.extract %131[0, 0, 0] : f32 from vector<1x1x1xf32>
    %cst_62 = arith.constant 2.000000e+00 : f32
    %133 = arith.divf %132, %cst_62 : f32
    %cst_63 = arith.constant 5.000000e-01 : f32
    %134 = arith.mulf %115, %cst_63 : f32
    %c0_64 = arith.constant 0 : index
    %135 = memref.load %arg9[%c0_64] : memref<2xf32, #tpu.memory_space<smem>>
    memref.store %104, %arg9[%c0_64] : memref<2xf32, #tpu.memory_space<smem>>
    %136 = arith.subf %133, %134 : f32
    %cst_65 = arith.constant 5.000000e-01 : f32
    %137 = arith.mulf %cst_65, %136 : f32
    %c1_66 = arith.constant 1 : index
    %138 = memref.load %arg9[%c1_66] : memref<2xf32, #tpu.memory_space<smem>>
    memref.store %137, %arg9[%c1_66] : memref<2xf32, #tpu.memory_space<smem>>
    return
  }
  func.func @transform_0(%arg0: i32) -> (i32, i32) {
    %c0_i32 = arith.constant 0 : i32
    %c0_i32_0 = arith.constant 0 : i32
    %c0_i32_1 = arith.constant 0 : i32
    return %c0_i32, %c0_i32_0 : i32, i32
  }
  func.func @transform_1(%arg0: i32) -> (i32, i32) {
    %c0_i32 = arith.constant 0 : i32
    %c0_i32_0 = arith.constant 0 : i32
    %c0_i32_1 = arith.constant 0 : i32
    return %c0_i32, %c0_i32_0 : i32, i32
  }
  func.func @transform_2(%arg0: i32) -> (i32, i32) {
    %c0_i32 = arith.constant 0 : i32
    %c0_i32_0 = arith.constant 0 : i32
    %c0_i32_1 = arith.constant 0 : i32
    return %c0_i32, %c0_i32_0 : i32, i32
  }
  func.func @transform_3(%arg0: i32) -> (i32, i32, i32) {
    %c0_i32 = arith.constant 0 : i32
    %c0_i32_0 = arith.constant 0 : i32
    %c0_i32_1 = arith.constant 0 : i32
    %c0_i32_2 = arith.constant 0 : i32
    return %c0_i32, %c0_i32_0, %c0_i32_1 : i32, i32, i32
  }
  func.func @transform_4(%arg0: i32) -> (i32, i32, i32) {
    %c0_i32 = arith.constant 0 : i32
    %c0_i32_0 = arith.constant 0 : i32
    %c0_i32_1 = arith.constant 0 : i32
    %c0_i32_2 = arith.constant 0 : i32
    return %c0_i32, %c0_i32_0, %c0_i32_1 : i32, i32, i32
  }
  func.func @transform_5(%arg0: i32) -> (i32, i32) {
    %c0_i32 = arith.constant 0 : i32
    %c0_i32_0 = arith.constant 0 : i32
    %c0_i32_1 = arith.constant 0 : i32
    return %c0_i32, %c0_i32_0 : i32, i32
  }
  func.func @transform_6(%arg0: i32) -> (i32, i32, i32) {
    %c0_i32 = arith.constant 0 : i32
    %c0_i32_0 = arith.constant 0 : i32
    %c0_i32_1 = arith.constant 0 : i32
    %c0_i32_2 = arith.constant 0 : i32
    return %c0_i32, %c0_i32_0, %c0_i32_1 : i32, i32, i32
  }
  func.func @transform_7(%arg0: i32) -> (i32, i32) {
    %c0_i32 = arith.constant 0 : i32
    %c0_i32_0 = arith.constant 0 : i32
    %c0_i32_1 = arith.constant 0 : i32
    return %c0_i32, %c0_i32_0 : i32, i32
  }
  func.func @transform_8(%arg0: i32) -> i32 {
    %c0_i32 = arith.constant 0 : i32
    %c0_i32_0 = arith.constant 0 : i32
    return %c0_i32 : i32
  }
}

</mosaic_0001>

<bundles_post_ra>
// kernel: splitnet_forward.1
= control target key start
LH: loop header
LB: loop body
LE: loop exit
PB: predicated region body
PF: predicated region fallthrough
CT: control target
= control target key end

     0   :  { %14 = vsyncpa [#allocation3], 0  ;;  %s2143_s0 = inlined_call_operand.vmem [shape: bf16[512,36], index: 0, kind: input, shape index: {}]   ;;  %s2144_s1 = inlined_call_operand.vmem [shape: bf16[36,64], index: 1, kind: input, shape index: {}]   ;;  %s2145_s2 = inlined_call_operand.vmem [shape: f32[1,64], index: 2, kind: input, shape index: {}]   ;;  %s2146_s3 = inlined_call_operand.vmem [shape: f32[2,32,10], index: 3, kind: input, shape index: {}]   ;;  %s2147_s4 = inlined_call_operand.vmem [shape: f32[2,1,10], index: 4, kind: input, shape index: {}]   ;;  %s2148_s5 = inlined_call_operand.vmem [shape: f32[2,10], index: 5, kind: input, shape index: {}]   ;;  %s2149_s6 = inlined_call_operand.hbm [shape: f32[2,2,10], index: 6, kind: output, shape index: {0}]   ;;  %s2150_s7 = inlined_call_operand.hbm [shape: f32[2,10], index: 7, kind: output, shape index: {1}]   ;;  %s2151_s8 = inlined_call_operand.vmem [shape: f32[2], index: 8, kind: output, shape index: {2}]  }
   0x1   :  { %15 = vsyncpa [#allocation6], 0  ;;  %v1576_v0 = vld [vmem:[%s2144_s1 + $0x10] ss:$0 sps:$4 sm:$0x33]   ;;  %vm378_vm0 = vcmask 1041408  }
   0x2   :  { %v1577_v1 = vld [vmem:[%s2144_s1 + $0x8] sm:$0xff]   ;;  %1555 = vmatprep.subr.msk.bf16.mxu0 %vm378_vm0, %v1576_v0  ;;  %v380_v2 = vsel %vm378_vm0, %v1576_v0, 0  ;;  %vm281_vm1 = vcmask 293888   ;;  %1556 = vmatprep.subr.msk.bf16.mxu1 %vm378_vm0, %v1576_v0  ;;  %v1579_v3 = vld [vmem:[%s2143_s0] sm:$0xff]   ;;  %v1581_v6 = vld [vmem:[%s2143_s0 + $0x10] sm:$0xff]  }
   0x3   :  { %1458 = vmatpush3.bf16.msra.mxu0 %v380_v2  ;;  %1552 = vmatpush3.bf16.msra.mxu1 %v380_v2  ;;  %v1578_v4 = vld [vmem:[%s2144_s1] sm:$0xff]   ;;  %v1580_v5 = vld [vmem:[%s2143_s0 + $0x8] sm:$0xff]   ;;  %v1582_v7 = vld [vmem:[%s2143_s0 + $0x18] sm:$0xff]  }
   0x4   :  { %1459 = vmatprep.subr.bf16.mxu0 %v1577_v1  ;;  %1550 = vmatprep.subr.bf16.mxu1 %v1577_v1  ;;  %v1583_v8 = vld [vmem:[%s2143_s0 + $0x20] sm:$0xff]   ;;  %v1596_v10 = vld [vmem:[%s2143_s0 + $0xc8] sm:$0xff]   ;;  %v1599_v11 = vld [vmem:[%s2143_s0 + $0xd0] sm:$0xff]  }
   0x5   :  { %1463 = vmatprep.mubr.msk.bf16.mxu0 %vm281_vm1, %v1579_v3  ;;  %v1595_v9 = vld [vmem:[%s2143_s0 + $0xc0] sm:$0xff]   ;;  %v1584_v12 = vld [vmem:[%s2143_s0 + $0x28] sm:$0xff]   ;;  %v1585_v13 = vld [vmem:[%s2143_s0 + $0x30] sm:$0xff]  }
   0x6   :  { %1511 = vmatprep.mubr.msk.bf16.mxu1 %vm281_vm1, %v1595_v9  ;;  %v1600_v14 = vld [vmem:[%s2143_s0 + $0xd8] sm:$0xff]   ;;  %v1603_v15 = vld [vmem:[%s2143_s0 + $0xe0] sm:$0xff]   ;;  %v1604_v17 = vld [vmem:[%s2143_s0 + $0xe8] sm:$0xff]  }
   0x7   :  { %1460 = vmatpush3.bf16.msra.mxu0 %v1577_v1  ;;  %1553 = vmatpush3.bf16.msra.mxu1 %v1577_v1  ;;  %v1586_v16 = vld [vmem:[%s2143_s0 + $0x38] sm:$0xff]   ;;  %v1587_v18 = vld [vmem:[%s2143_s0 + $0x40] sm:$0xff]   ;;  %v1607_v19 = vld [vmem:[%s2143_s0 + $0xf0] sm:$0xff]  }
   0x8   :  { %1461 = vmatprep.subr.bf16.mxu0 %v1578_v4  ;;  %1551 = vmatprep.subr.bf16.mxu1 %v1578_v4 }
   0xb   :  { %1462 = vmatpush3.bf16.msra.mxu0 %v1578_v4  ;;  %1554 = vmatpush3.bf16.msra.mxu1 %v1578_v4 }
   0xe   :  { %1464 = vmatmul.mubr.msk.bf16.vlgmr.msra.gmra.mxu0 %vm281_vm1, %v1580_v5  ;;  %1512 = vmatmul.mubr.msk.bf16.vlgmr.msra.gmra.mxu1 %vm281_vm1, %v1596_v10 }
   0xf   :  { %1467 = vmatprep.mubr.msk.bf16.mxu0 %vm281_vm1, %v1581_v6  ;;  %1515 = vmatprep.mubr.msk.bf16.mxu1 %vm281_vm1, %v1599_v11 }
  0x16   :  { %1468 = vmatmul.mubr.msk.bf16.gmra.mxu0 %vm281_vm1, %v1582_v7  ;;  %1516 = vmatmul.mubr.msk.bf16.gmra.mxu1 %vm281_vm1, %v1600_v14 }
  0x17   :  { %1471 = vmatprep.mubr.msk.bf16.mxu0 %vm281_vm1, %v1583_v8  ;;  %1519 = vmatprep.mubr.msk.bf16.mxu1 %vm281_vm1, %v1603_v15 }
  0x1e   :  { %1472 = vmatmul.mubr.msk.bf16.gmra.mxu0 %vm281_vm1, %v1584_v12 }
  0x1f   :  { %1475 = vmatprep.mubr.msk.bf16.mxu0 %vm281_vm1, %v1585_v13 }
  0x20   :  { %16 = vsyncpa [#allocation4], 0  ;;  %1520 = vmatmul.mubr.msk.bf16.gmra.mxu1 %vm281_vm1, %v1604_v17  ;;  %v1588_v20 = vld [vmem:[%s2143_s0 + $0x48] sm:$0xff]   ;;  %v1608_v21 = vld [vmem:[%s2143_s0 + $0xf8] sm:$0xff]   ;;  %v735_v36 = vlaneseq  ;;  %v1683_v43 = vmov 0.00390625   ;;  %vm1685_vm14 = vmmov 0  }
  0x21   :  { %1523 = vmatprep.mubr.msk.bf16.mxu1 %vm281_vm1, %v1607_v19  ;;  %v1589_v22 = vld [vmem:[%s2143_s0 + $0x50] sm:$0xff]   ;;  %v1590_v23 = vld [vmem:[%s2143_s0 + $0x58] sm:$0xff]   ;;  %v1591_v24 = vld [vmem:[%s2143_s0 + $0x60] sm:$0xff]   ;;  %vm913_vm15 = vcmask 261120   ;;  %s1686_s16 = smov 96   ;;  %vm987_vm0 = vcmask 74752  }
  0x22   :  { %v1592_v25 = vld [vmem:[%s2143_s0 + $0x68] sm:$0xff]   ;;  %v1593_v26 = vld [vmem:[%s2143_s0 + $0x70] sm:$0xff]   ;;  %v1594_v27 = vld [vmem:[%s2143_s0 + $0x78] sm:$0xff]   ;;  %v736_v37 = vshrl.u32 %v735_v36, 7  ;;  %v738_v38 = vand.u32 127, %v735_v36  ;;  %s1688_s27 = smov [#allocation5]  }
  0x23   :  { %v1597_v28 = vld [vmem:[%s2143_s0 + $0x80] sm:$0xff]   ;;  %v1598_v29 = vld [vmem:[%s2143_s0 + $0x88] sm:$0xff]   ;;  %v1601_v30 = vld [vmem:[%s2143_s0 + $0x90] sm:$0xff]  }
  0x24   :  { %v1602_v31 = vld [vmem:[%s2143_s0 + $0x98] sm:$0xff]   ;;  %v1605_v32 = vld [vmem:[%s2143_s0 + $0xa0] sm:$0xff]   ;;  %v1606_v33 = vld [vmem:[%s2143_s0 + $0xa8] sm:$0xff]   ;;  %v747_v39 = vadd.s32 1, %v736_v37  ;;  %v739_v40 = vadd.s32 128, %v738_v38  ;;  %v742_v41 = vmul.u32 256, %v736_v37 }
  0x25   :  { %v1609_v34 = vld [vmem:[%s2143_s0 + $0xb0] sm:$0xff]   ;;  %v1610_v35 = vld [vmem:[%s2143_s0 + $0xb8] sm:$0xff]   ;;  %v741_v45 = vadd.s32 384, %v738_v38  ;;  %v740_v46 = vadd.s32 256, %v738_v38  ;;  %s1234_s0 = sshll.u32 %s1688_s27, 4  ;;  %s1235_s0 = int_to_ptr.vmem [resolvable:$true] %s1234_s0 }
  0x26   :  { %1476 = vmatmul.mubr.msk.bf16.gmra.mxu0 %vm281_vm1, %v1586_v16  ;;  %v748_v42 = vmul.u32 256, %v747_v39  ;;  %vm744_vm2 = vcmp.ge.s32.totalorder %v739_v40, %v742_v41  ;;  %vm743_vm5 = vcmp.ge.s32.totalorder %v738_v38, %v742_v41 }
  0x27   :  { %1479 = vmatprep.mubr.msk.bf16.mxu0 %vm281_vm1, %v1587_v18  ;;  %vm746_vm8 = vcmp.ge.s32.totalorder %v741_v45, %v742_v41  ;;  %vm745_vm11 = vcmp.ge.s32.totalorder %v740_v46, %v742_v41 }
  0x28   :  { %1524 = vmatmul.mubr.msk.bf16.gmra.mxu1 %vm281_vm1, %v1608_v21  ;;  %vm750_vm3 = vcmp.lt.s32.totalorder %v739_v40, %v748_v42  ;;  %vm749_vm6 = vcmp.lt.s32.totalorder %v738_v38, %v748_v42  ;;  %vm752_vm9 = vcmp.lt.s32.totalorder %v741_v45, %v748_v42  ;;  %vm751_vm12 = vcmp.lt.s32.totalorder %v740_v46, %v748_v42 }
  0x29   :  { %vm754_vm4 = vmand %vm744_vm2, %vm750_vm3 }
  0x2a   :  { %1329 = vmatprep.mubr.msk.f32.mxu1 %vm754_vm4, %v1683_v43  ;;  %vm1875_vm7 = vmand %vm743_vm5, %vm749_vm6 }
  0x2b   :  { %vm1879_vm10 = vmand %vm746_vm8, %vm752_vm9 }
  0x2c   :  { %vm1885_vm13 = vmand %vm745_vm11, %vm751_vm12 }
  0x2e   :  { %1480 = vmatmul.mubr.msk.bf16.gmra.mxu0 %vm281_vm1, %v1588_v20 }
  0x2f   :  { %1483 = vmatprep.mubr.msk.bf16.mxu0 %vm281_vm1, %v1589_v22  ;;  %v1940_v22 = vld [vmem:[%s2145_s2] ss:$0 sm:$0xff] }
  0x36   :  { %1484 = vmatmul.mubr.msk.bf16.gmra.mxu0 %vm281_vm1, %v1590_v23 }
  0x37   :  { %1487 = vmatprep.mubr.msk.bf16.mxu0 %vm281_vm1, %v1591_v24 }
  0x3e   :  { %1488 = vmatmul.mubr.msk.bf16.gmra.mxu0 %vm281_vm1, %v1592_v25 }
  0x3f   :  { %1491 = vmatprep.mubr.msk.bf16.mxu0 %vm281_vm1, %v1593_v26 }
  0x46   :  { %1492 = vmatmul.mubr.msk.bf16.gmra.mxu0 %vm281_vm1, %v1594_v27 }
  0x47   :  { %1495 = vmatprep.mubr.msk.bf16.mxu0 %vm281_vm1, %v1597_v28 }
  0x4e   :  { %1496 = vmatmul.mubr.msk.bf16.gmra.mxu0 %vm281_vm1, %v1598_v29 }
  0x4f   :  { %1499 = vmatprep.mubr.msk.bf16.mxu0 %vm281_vm1, %v1601_v30 }
  0x56   :  { %1500 = vmatmul.mubr.msk.bf16.gmra.mxu0 %vm281_vm1, %v1602_v31 }
  0x57   :  { %1503 = vmatprep.mubr.msk.bf16.mxu0 %vm281_vm1, %v1605_v32 }
  0x5e   :  { %1504 = vmatmul.mubr.msk.bf16.gmra.mxu0 %vm281_vm1, %v1606_v33 }
  0x5f   :  { %1507 = vmatprep.mubr.msk.bf16.mxu0 %vm281_vm1, %v1609_v34 }
  0x66   :  { %1508 = vmatmul.mubr.msk.bf16.gmra.mxu0 %vm281_vm1, %v1610_v35  ;;  %vm1008_vm1 = vcmask 1024  }
  0xce   :  { %v1883_v48 = vpop.f32.mrf.mxu0  ;;  %v1909_v2 = vpop.f32.mrf.mxu1 }
  0xd0   :  { %v1889_v50 = vpop.f32.mrf.mxu0  ;;  %v1915_v5 = vpop.f32.mrf.mxu1 }
  0xd2   :  { %v1891_v51 = vpop.f32.mrf.mxu0  ;;  %v1921_v8 = vpop.f32.mrf.mxu1 }
  0xd4   :  { %v1893_v52 = vpop.f32.mrf.mxu0  ;;  %v1927_v11 = vpop.f32.mrf.mxu1 }
  0xd6   :  { %v1895_v53 = vpop.f32.mrf.mxu0  ;;  %v1931_v14 = vpop.f32.mrf.mxu1 }
  0xd8   :  { %v1897_v54 = vpop.f32.mrf.mxu0  ;;  %v1933_v17 = vpop.f32.mrf.mxu1 }
  0xda   :  { %v1899_v55 = vpop.f32.mrf.mxu0  ;;  %v1935_v20 = vpop.f32.mrf.mxu1 }
  0xdc   :  { %v1901_v56 = vpop.f32.mrf.mxu0  ;;  %v1943_v25 = vpop.f32.mrf.mxu1 }
  0xde   :  { %v1473_v57 = vpop.f32.mrf.mxu0 }
  0xe0   :  { %v1903_v58 = vpop.f32.mrf.mxu0  ;;  %v1952_v35 = vpop.f32.mrf.mxu1 }
  0xe1   :  { %v649_v44 = vadd.f32 %v1952_v35, %v1940_v22 }
  0xe2   :  { %v1474_v59 = vpop.f32.mrf.mxu0 }
  0xe3   :  { %v460_v45 = vadd.f32 %v1474_v59, %v1940_v22 }
  0xe4   :  { %v1905_v60 = vpop.f32.mrf.mxu0 }
  0xe5   :  { %v682_v59 = vmax.f32 %v460_v45, 0.0  ;;  %v436_v45 = vadd.f32 %v1940_v22, %v1901_v56 }
  0xe6   :  { %v1477_v61 = vpop.f32.mrf.mxu0 }
  0xe7   :  { %v473_v28 = vadd.f32 %v1477_v61, %v1940_v22 }
  0xe8   :  { %v464_v62 = vpop.f32.mrf.mxu0 }
  0xe9   :  { %v685_v38 = vmax.f32 %v473_v28, 0.0  ;;  %v465_v39 = vadd.f32 %v1940_v22, %v464_v62  ;;  %v457_v62 = vadd.f32 %v1473_v57, %v1940_v22 }
  0xea   :  { %v1478_v63 = vpop.f32.mrf.mxu0 }
  0xeb   :  { %v476_v23 = vadd.f32 %v1478_v63, %v1940_v22  ;;  %v1962_v63 = vpop.f32.mrf.mxu1 }
  0xec   :  { %v467_v0 = vpop.f32.mrf.mxu0  ;;  %v641_v35 = vadd.f32 %v1940_v22, %v1962_v63 }
  0xed   :  { %v686_v32 = vmax.f32 %v476_v23, 0.0  ;;  %v468_v33 = vadd.f32 %v1940_v22, %v467_v0 }
  0xee   :  { %v1907_v1 = vpop.f32.mrf.mxu0  ;;  %v727_v63 = vmax.f32 %v641_v35, 0.0 }
  0xef   :  { %v684_v46 = vmax.f32 %v468_v33, 0.0 }
  0xf0   :  { %v1911_v3 = vpop.f32.mrf.mxu0 }
  0xf2   :  { %v1913_v4 = vpop.f32.mrf.mxu0 }
  0xf4   :  { %v1917_v6 = vpop.f32.mrf.mxu0 }
  0xf6   :  { %v1919_v7 = vpop.f32.mrf.mxu0 }
  0xf8   :  { %v1923_v9 = vpop.f32.mrf.mxu0 }
  0xfa   :  { %v1925_v10 = vpop.f32.mrf.mxu0 }
  0xfc   :  { %v1929_v12 = vpop.f32.mrf.mxu0 }
  0xfe   :  { %v1489_v13 = vpop.f32.mrf.mxu0 }
  0xff   :  { %v521_v0 = vadd.f32 %v1489_v13, %v1940_v22  ;;  %v1973_v13 = vpop.f32.mrf.mxu1 }
 0x100   :  { %v512_v15 = vpop.f32.mrf.mxu0 }
 0x101   :  { %v697_v28 = vmax.f32 %v521_v0, 0.0  ;;  %v513_v57 = vadd.f32 %v1940_v22, %v512_v15  ;;  %v1986_v15 = vpop.f32.mrf.mxu1 }
 0x102   :  { %v1490_v16 = vpop.f32.mrf.mxu0 }
 0x103   :  { %v524_v41 = vadd.f32 %v1490_v16, %v1940_v22 }
 0x104   :  { %v515_v18 = vpop.f32.mrf.mxu0 }
 0x105   :  { %v698_v16 = vmax.f32 %v524_v41, 0.0 }
 0x106   :  { %v1493_v19 = vpop.f32.mrf.mxu0 }
 0x107   :  { %v537_v26 = vadd.f32 %v1493_v19, %v1940_v22 }
 0x108   :  { %v528_v21 = vpop.f32.mrf.mxu0 }
 0x109   :  { %v701_v36 = vmax.f32 %v537_v26, 0.0  ;;  %v529_v37 = vadd.f32 %v1940_v22, %v528_v21  ;;  %v683_v21 = vmax.f32 %v465_v39, 0.0  ;;  %v452_v26 = vadd.f32 %v1940_v22, %v1905_v60 }
 0x10a   :  { %v1494_v24 = vpop.f32.mrf.mxu0 }
 0x10b   :  { %v540_v27 = vadd.f32 %v1494_v24, %v1940_v22  ;;  %v699_v19 = vmax.f32 %v529_v37, 0.0  ;;  %v516_v24 = vadd.f32 %v1940_v22, %v515_v18  ;;  %v508_v18 = vadd.f32 %v1925_v10, %v1940_v22 }
 0x10c   :  { %v531_v29 = vpop.f32.mrf.mxu0  ;;  %v680_v33 = vmax.f32 %v452_v26, 0.0  ;;  %v695_v37 = vmax.f32 %v513_v57, 0.0 }
 0x10d   :  { %v702_v30 = vmax.f32 %v540_v27, 0.0  ;;  %v532_v31 = vadd.f32 %v1940_v22, %v531_v29  ;;  %v681_v29 = vmax.f32 %v457_v62, 0.0  ;;  %v696_v60 = vmax.f32 %v516_v24, 0.0 }
 0x10e   :  { %v1950_v34 = vpop.f32.mrf.mxu0  ;;  %v694_v41 = vmax.f32 %v508_v18, 0.0  ;;  %v433_v62 = vadd.f32 %v1940_v22, %v1897_v54  ;;  %v676_v24 = vmax.f32 %v436_v45, 0.0  ;;  %v425_v54 = vadd.f32 %v1883_v48, %v1940_v22 }
 0x10f   :  { %1377 = vmatprep.subr.mxu1 %v702_v30  ;;  %v700_v42 = vmax.f32 %v532_v31, 0.0  ;;  %v449_v30 = vadd.f32 %v1940_v22, %v1903_v58  ;;  %v505_v58 = vadd.f32 %v1919_v7, %v1940_v22  ;;  %v1525_v7 = vpop.f32.mrf.mxu1  ;;  %v420_v18 = vadd.f32 %v1940_v22, %v1893_v52 }
 0x110   :  { %v1956_v40 = vpop.f32.mrf.mxu0  ;;  %1378 = vmatpush3.msra.mxu1 %v686_v32  ;;  %v444_v32 = vadd.f32 %v1899_v55, %v1940_v22  ;;  %v500_v55 = vadd.f32 %v1940_v22, %v1929_v12  ;;  %v492_v12 = vadd.f32 %v1913_v4, %v1940_v22  ;;  %v675_v57 = vmax.f32 %v433_v62, 0.0 }
 0x111   :  { %1379 = vmatprep.subr.mxu1 %v701_v36  ;;  %v679_v10 = vmax.f32 %v449_v30, 0.0  ;;  %v693_v0 = vmax.f32 %v505_v58, 0.0  ;;  %v656_v26 = vpop.f32.mrf.mxu1  ;;  %v484_v30 = vadd.f32 %v1940_v22, %v1917_v6  ;;  %v673_v48 = vmax.f32 %v425_v54, 0.0 }
 0x112   :  { %v1960_v61 = vpop.f32.mrf.mxu0  ;;  %1380 = vmatpush3.msra.mxu1 %v685_v38  ;;  %v441_v38 = vadd.f32 %v1895_v53, %v1940_v22  ;;  %v497_v53 = vadd.f32 %v1940_v22, %v1923_v9  ;;  %v692_v56 = vmax.f32 %v500_v55, 0.0  ;;  %v489_v9 = vadd.f32 %v1907_v1, %v1940_v22 }
 0x113   :  { %1381 = vmatprep.subr.mxu1 %v700_v42  ;;  %v678_v42 = vmax.f32 %v444_v32, 0.0  ;;  %v690_v4 = vmax.f32 %v492_v12, 0.0  ;;  %v417_v58 = vadd.f32 %v1940_v22, %v1889_v50  ;;  %v688_v6 = vmax.f32 %v484_v30, 0.0 }
 0x114   :  { %v1966_v23 = vpop.f32.mrf.mxu0  ;;  %1382 = vmatpush3.msra.mxu1 %v684_v46  ;;  %v689_v1 = vmax.f32 %v489_v9, 0.0  ;;  %v652_v9 = vadd.f32 %v1973_v13, %v1940_v22  ;;  %v644_v13 = vadd.f32 %v1940_v22, %v1986_v15 }
 0x115   :  { %1383 = vmatprep.subr.mxu1 %v699_v19  ;;  %v677_v19 = vmax.f32 %v441_v38, 0.0  ;;  %v671_v45 = vmax.f32 %v417_v58, 0.0 }
 0x116   :  { %v1971_v27 = vpop.f32.mrf.mxu0  ;;  %1384 = vmatpush3.msra.mxu1 %v683_v21  ;;  %v730_v47 = vmax.f32 %v652_v9, 0.0  ;;  %v1338_v9 = vld [vmem:[%s2146_s3 + $0x38] sm:$0xff] }
 0x117   :  { %1385 = vmatprep.subr.mxu1 %v698_v16  ;;  %v428_v16 = vadd.f32 %v1891_v51, %v1940_v22 }
 0x118   :  { %v1978_v31 = vpop.f32.mrf.mxu0  ;;  %1386 = vmatpush3.msra.mxu1 %v682_v59 }
 0x119   :  { %1387 = vmatprep.subr.mxu1 %v697_v28  ;;  %v691_v28 = vmax.f32 %v497_v53, 0.0  ;;  %v674_v51 = vmax.f32 %v428_v16, 0.0  ;;  %v657_v16 = vadd.f32 %v1940_v22, %v656_v26 }
 0x11a   :  { %v1984_v36 = vpop.f32.mrf.mxu0  ;;  %1388 = vmatpush3.msra.mxu1 %v681_v29 }
 0x11b   :  { %1389 = vmatprep.subr.mxu1 %v696_v60  ;;  %v1526_v60 = vpop.f32.mrf.mxu1  ;;  %v572_v15 = vadd.f32 %v1984_v36, %v1940_v22 }
 0x11c   :  { %v1992_v39 = vpop.f32.mrf.mxu0  ;;  %1390 = vmatpush3.msra.mxu1 %v680_v33  ;;  %v481_v33 = vadd.f32 %v1940_v22, %v1911_v3  ;;  %v668_v38 = vadd.f32 %v1526_v60, %v1940_v22 }
 0x11d   :  { %1391 = vmatprep.subr.mxu1 %v695_v37  ;;  %v659_v52 = vpop.f32.mrf.mxu1  ;;  %v564_v36 = vadd.f32 %v1940_v22, %v1992_v39 }
 0x11e   :  { %v1998_v46 = vpop.f32.mrf.mxu0  ;;  %1392 = vmatpush3.msra.mxu1 %v679_v10  ;;  %v672_v10 = vmax.f32 %v420_v18, 0.0  ;;  %v687_v55 = vmax.f32 %v481_v33, 0.0  ;;  %v734_v53 = vmax.f32 %v668_v38, 0.0  ;;  %v729_v18 = vmax.f32 %v649_v44, 0.0 }
 0x11f   :  { %1393 = vmatprep.subr.mxu1 %v694_v41  ;;  %v633_v33 = vadd.f32 %v1931_v14, %v1940_v22  ;;  %v625_v14 = vadd.f32 %v1940_v22, %v1933_v17  ;;  %v708_v39 = vmax.f32 %v564_v36, 0.0 }
 0x120   :  { %v2004_v21 = vpop.f32.mrf.mxu0  ;;  %1394 = vmatpush3.msra.mxu1 %v678_v42  ;;  %v665_v42 = vadd.f32 %v1525_v7, %v1940_v22 }
 0x121   :  { %1395 = vmatprep.subr.mxu1 %v693_v0  ;;  %v723_v17 = vmax.f32 %v625_v14, 0.0 }
 0x122   :  { %v1506_v59 = vpop.f32.mrf.mxu0  ;;  %1396 = vmatpush3.msra.mxu1 %v677_v19  ;;  %v660_v19 = vadd.f32 %v1940_v22, %v659_v52  ;;  %v556_v52 = vadd.f32 %v1960_v61, %v1940_v22  ;;  %v548_v61 = vadd.f32 %v1940_v22, %v1966_v23  ;;  %v903_v23 = vld [vmem:[%s2146_s3 + $0x8] sm:$0xff] }
 0x123   :  { %1397 = vmatprep.subr.mxu1 %v692_v56  ;;  %v733_v56 = vmax.f32 %v665_v42, 0.0  ;;  %v588_v26 = vadd.f32 %v1506_v59, %v1940_v22 }
 0x124   :  { %v579_v29 = vpop.f32.mrf.mxu0  ;;  %1398 = vmatpush3.msra.mxu1 %v676_v24 }
 0x125   :  { %1399 = vmatprep.subr.mxu1 %v691_v28  ;;  %v732_v28 = vmax.f32 %v660_v19, 0.0  ;;  %v580_v59 = vadd.f32 %v1940_v22, %v579_v29 }
 0x126   :  { %v1509_v32 = vpop.f32.mrf.mxu0  ;;  %1400 = vmatpush3.msra.mxu1 %v675_v57  ;;  %v731_v57 = vmax.f32 %v657_v16, 0.0 }
 0x127   :  { %1401 = vmatprep.subr.mxu1 %v690_v4  ;;  %v601_v0 = vadd.f32 %v1509_v32, %v1940_v22  ;;  %v585_v4 = vadd.f32 %v1998_v46, %v1940_v22  ;;  %v577_v46 = vadd.f32 %v1940_v22, %v2004_v21  ;;  %v636_v32 = vadd.f32 %v1935_v20, %v1940_v22 }
 0x128   :  { %v592_v37 = vpop.f32.mrf.mxu0  ;;  %1402 = vmatpush3.msra.mxu1 %v674_v51  ;;  %v714_v51 = vmax.f32 %v588_v26, 0.0  ;;  %v712_v29 = vmax.f32 %v580_v59, 0.0  ;;  %v628_v20 = vadd.f32 %v1940_v22, %v1943_v25  ;;  %v1336_v26 = vld [vmem:[%s2146_s3 + $0x28] sm:$0xff] }
 0x129   :  { %1403 = vmatprep.subr.mxu1 %v689_v1  ;;  %v717_v7 = vmax.f32 %v601_v0, 0.0  ;;  %v593_v24 = vadd.f32 %v1940_v22, %v592_v37  ;;  %v713_v60 = vmax.f32 %v585_v4, 0.0  ;;  %v728_v1 = vmax.f32 %v644_v13, 0.0 }
 0x12a   :  { %v1510_v41 = vpop.f32.mrf.mxu0  ;;  %1404 = vmatpush3.msra.mxu1 %v673_v48  ;;  %v569_v48 = vadd.f32 %v1971_v27, %v1940_v22  ;;  %v711_v21 = vmax.f32 %v577_v46, 0.0  ;;  %v726_v58 = vmax.f32 %v636_v32, 0.0  ;;  %v710_v37 = vmax.f32 %v572_v15, 0.0 }
 0x12b   :  { %v604_v3 = vadd.f32 %v1510_v41, %v1940_v22  ;;  %1405 = vmatprep.subr.mxu1 %v688_v6  ;;  %v715_v30 = vmax.f32 %v593_v24, 0.0  ;;  %v725_v6 = vmax.f32 %v633_v33, 0.0  ;;  %v561_v27 = vadd.f32 %v1940_v22, %v1978_v31 }
 0x12c   :  { %v595_v50 = vpop.f32.mrf.mxu0  ;;  %1406 = vmatpush3.msra.mxu1 %v672_v10  ;;  %v709_v38 = vmax.f32 %v569_v48, 0.0  ;;  %v620_v10 = vadd.f32 %v1921_v8, %v1940_v22  ;;  %v724_v25 = vmax.f32 %v628_v20, 0.0  ;;  %v617_v41 = vadd.f32 %v1909_v2, %v1940_v22 }
 0x12d   :  { %v718_v62 = vmax.f32 %v604_v3, 0.0  ;;  %1407 = vmatprep.subr.mxu1 %v687_v55  ;;  %v596_v12 = vadd.f32 %v1940_v22, %v595_v50  ;;  %v553_v55 = vadd.f32 %v1950_v34, %v1940_v22  ;;  %v707_v31 = vmax.f32 %v561_v27, 0.0 }
 0x12e   :  { %1408 = vmatpush3.msra.mxu1 %v671_v45  ;;  %v722_v42 = vmax.f32 %v620_v10, 0.0  ;;  %v612_v8 = vadd.f32 %v1940_v22, %v1927_v11  ;;  %v706_v3 = vmax.f32 %v556_v52, 0.0  ;;  %v721_v45 = vmax.f32 %v617_v41, 0.0 }
 0x12f   :  { %1330 = vmatmul.mubr.msk.f32.vlgmr.msra.gmra.mxu1 %vm1875_vm7, %v1683_v43  ;;  %1412 = vmatprep.subr.mxu1 %v734_v53  ;;  %v716_v54 = vmax.f32 %v596_v12, 0.0  ;;  %v609_v2 = vadd.f32 %v1940_v22, %v1915_v5  ;;  %v705_v0 = vmax.f32 %v553_v55, 0.0  ;;  %v545_v34 = vadd.f32 %v1940_v22, %v1956_v40  ;;  %v905_v22 = vld [vmem:[%s2146_s3 + $0x18] sm:$0xff]  ;;  %v904_v40 = vld [vmem:[%s2146_s3 + $0x10] sm:$0xff] }
 0x130   :  { %1413 = vmatpush3.msra.mxu1 %v718_v62  ;;  %1331 = vmatprep.mubr.msk.f32.mxu1 %vm1879_vm10, %v1683_v43  ;;  %v720_v50 = vmax.f32 %v612_v8, 0.0  ;;  %v704_v53 = vmax.f32 %v548_v61, 0.0  ;;  %v1684_v5 = vmov 0.0  }
 0x131   :  { %1414 = vmatprep.subr.mxu1 %v733_v56  ;;  %v719_v11 = vmax.f32 %v609_v2, 0.0  ;;  %v703_v19 = vmax.f32 %v545_v34, 0.0 }
 0x132   :  { %1415 = vmatpush3.msra.mxu1 %v717_v7 }
 0x133   :  { %1416 = vmatprep.subr.mxu1 %v732_v28  ;;  %v1337_v28 = vld [vmem:[%s2146_s3 + $0x30] sm:$0xff] }
 0x134   :  { %1417 = vmatpush3.msra.mxu1 %v716_v54  ;;  %v1335_v54 = vld [vmem:[%s2146_s3 + $0x20] sm:$0xff] }
 0x135   :  { %1418 = vmatprep.subr.mxu1 %v731_v57  ;;  %v1333_v57 = vld [vmem:[%s2147_s4] ss:$0 sm:$0xff] }
 0x136   :  { %1419 = vmatpush3.msra.mxu1 %v715_v30 }
 0x137   :  { %1420 = vmatprep.subr.mxu1 %v730_v47 }
 0x138   :  { %1421 = vmatpush3.msra.mxu1 %v714_v51  ;;  %v1340_v51 = vld [vmem:[%s2147_s4 + $0x1] ss:$0 sm:$0xff] }
 0x139   :  { %1422 = vmatprep.subr.mxu1 %v729_v18 }
 0x13a   :  { %1423 = vmatpush3.msra.mxu1 %v713_v60 }
 0x13b   :  { %1424 = vmatprep.subr.mxu1 %v728_v1 }
 0x13c   :  { %1425 = vmatpush3.msra.mxu1 %v712_v29 }
 0x13d   :  { %1426 = vmatprep.subr.mxu1 %v727_v63 }
 0x13e   :  { %1427 = vmatpush3.msra.mxu1 %v711_v21 }
 0x13f   :  { %1428 = vmatprep.subr.mxu1 %v726_v58 }
 0x140   :  { %1429 = vmatpush3.msra.mxu1 %v710_v37 }
 0x141   :  { %1430 = vmatprep.subr.mxu1 %v725_v6  ;;  %v901_v6 = vld [vmem:[%s2148_s5] sm:$0x3]  ;;  %s1687_s5 = smov [#allocation2]  }
 0x142   :  { %1431 = vmatpush3.msra.mxu1 %v709_v38  ;;  %v1003_v27 = vsub.f32 0.0, %v901_v6  ;;  %s1221_s26 = sshll.u32 %s1687_s5, 4  ;;  %s1222_s26 = int_to_ptr.vmem [resolvable:$true] %s1221_s26 }
 0x143   :  { %1432 = vmatprep.subr.mxu1 %v724_v25  ;;  %s1625_s28 = scalar_lea.vmem %s1222_s26, 64  ;;  %p1630_p1 = scmp.lt.s32.totalorder %s1222_s26, %s1222_s26 }
 0x144   :  { %1433 = vmatpush3.msra.mxu1 %v708_v39  ;;  %p1626_p0 = scmp.ne.s32.totalorder %s1222_s26, %s1625_s28  ;;  %p1631_p2 = scmp.lt.s32.totalorder %s1625_s28, %s1625_s28 }
 0x145   :  { %1434 = vmatprep.subr.mxu1 %v723_v17 }
 0x146   :  { %1435 = vmatpush3.msra.mxu1 %v707_v31  ;;  %p1632_p3 = por %p1631_p2, %p1630_p1 }
 0x147   :  { %1436 = vmatprep.subr.mxu1 %v722_v42 }
 0x148   :  { %1437 = vmatpush3.msra.mxu1 %v706_v3  ;;  %p1633_p4 = pnand %p1632_p3, %p1626_p0 }
 0x149   :  { %1438 = vmatprep.subr.mxu1 %v721_v45 }
 0x14a   :  { %1439 = vmatpush3.msra.mxu1 %v705_v0 }
 0x14b   :  { %1440 = vmatprep.subr.mxu1 %v720_v50 }
 0x14c   :  { %1441 = vmatpush3.msra.mxu1 %v704_v53 }
 0x14d   :  { %1442 = vmatprep.subr.mxu1 %v719_v11 }
 0x14e   :  { %1443 = vmatpush3.msra.mxu1 %v703_v19 }
 0x14f   :  { %1332 = vmatmul.mubr.msk.f32.vlgmr.msra.gmra.mxu1 %vm1885_vm13, %v1683_v43  ;;  %1527 = vmatprep.subr.mxu1 %v1684_v5  ;;  %v902_v43 = vld [vmem:[%s2146_s3] sm:$0xff] }
 0x150   :  { %1528 = vmatpush3.msra.mxu1 %v905_v22  ;;  %1535 = vmatprep.mubr.msk.f32.mxu1 %vm1685_vm14, %v1684_v5 }
 0x151   :  { %1529 = vmatprep.subr.mxu1 %v1684_v5 }
 0x152   :  { %1530 = vmatpush3.msra.mxu1 %v904_v40 }
 0x153   :  { %1531 = vmatprep.subr.mxu1 %v1684_v5 }
 0x154   :  { %1532 = vmatpush3.msra.mxu1 %v903_v23 }
 0x155   :  { %1533 = vmatprep.subr.mxu1 %v1684_v5 }
 0x156   :  { %1534 = vmatpush3.msra.mxu1 %v902_v43 }
 0x157   :  { %1538 = vmatprep.subr.mxu1 %v1684_v5 }
 0x1ef   :  { %v1409_v49 = vpop.f32.mrf.mxu1 }
 0x1f1   :  { %v1410_v62 = vpop.f32.mrf.mxu1 }
 0x1f2   :  { %v1411_v16 = vadd.f32 %v1410_v62, %v1409_v49 }
 0x20f   :  { %v1444_v12 = vpop.f32.mrf.mxu1 }
 0x211   :  { %v1445_v56 = vpop.f32.mrf.mxu1 }
 0x212   :  { %v1446_v7 = vadd.f32 %v1445_v56, %v1444_v12 }
 0x214   :  { %v898_v24 = vadd.f32 %v1446_v7, %v1411_v16 }
 0x216   :  { %1057 = vrot.lane.b32.xlu0 %v898_v24, %s1686_s16  ;;  %1536 = vmatmul.mubr.msk.f32.vlgmr.msra.gmra.mxu1 %vm913_vm15, %v898_v24 }
 0x217   :  { %1539 = vmatpush3.msra.mxu1 %v1338_v9  ;;  %1546 = vmatprep.mubr.msk.f32.mxu1 %vm1685_vm14, %v1684_v5 }
 0x218   :  { %1540 = vmatprep.subr.mxu1 %v1684_v5 }
 0x219   :  { %1541 = vmatpush3.msra.mxu1 %v1337_v28 }
 0x21a   :  { %1542 = vmatprep.subr.mxu1 %v1684_v5 }
 0x21b   :  { %1543 = vmatpush3.msra.mxu1 %v1336_v26 }
 0x21c   :  { %1544 = vmatprep.subr.mxu1 %v1684_v5 }
 0x21d   :  { %1545 = vmatpush3.msra.mxu1 %v1335_v54 }
 0x288   :  { %v1058_v44 = vpop.permute.xlu0 %1057 }
 0x289   :  { %1547 = vmatmul.mubr.msk.f32.vlgmr.msra.gmra.mxu1 %vm913_vm15, %v1058_v44 }
 0x2d6   :  { %v983_v4 = vpop.f32.mrf.mxu1 }
 0x2d7   :  { %v984_v30 = vadd.f32 %v1333_v57, %v983_v4 }
 0x2d8   :  { %v1537_v47 = vpop.f32.mrf.mxu1 }
 0x2d9   :  { %v989_v13 = vsel %vm987_vm0, %v984_v30, -inf  ;;  %988 = vst.msk [vmem:[#allocation2] sm:$0x3] %vm987_vm0, %v984_v30 }
 0x2da   :  { %990 = vmax.xlane.f32.xlu0 %v989_v13 }
 0x349   :  { %v1127_v59 = vpop.f32.mrf.mxu1 }
 0x34a   :  { %v1128_v18 = vadd.f32 %v1340_v51, %v1127_v59 }
 0x34b   :  { %v1548_v35 = vpop.f32.mrf.mxu1 }
 0x34c   :  { %1132 = vst.msk [vmem:[#allocation2 + $0x2] sm:$0x3] %vm987_vm0, %v1128_v18  ;;  %v1133_v60 = vsel %vm987_vm0, %v1128_v18, -inf  ;;  %v1184_v46 = vadd.f32 %v1128_v18, %v984_v30 }
 0x34d   :  { %1134 = vmax.xlane.f32.xlu1 %v1133_v60 }
 0x34e   :  { %v1186_v32 = vmul.f32 0.5, %v1184_v46 }
 0x350   :  { %1187 = vst.msk [vmem:[#allocation5] sm:$0x3] %vm987_vm0, %v1186_v32 }
 0x363   :  { %v991_v1 = vpop.xlane.xlu0 %990 }
 0x364   :  { %v992_v15 = vsub.f32 %v984_v30, %v991_v1 }
 0x366   :  { %v993_v29 = vmul.f32 1.442695, %v992_v15 }
 0x368   :  { %1611 = vpow2.f32 %v993_v29 }
 0x375   :  { %v1612_v33 = vpop.eup %1611 }
 0x376   :  { %v995_v63 = vsel %vm987_vm0, %v1612_v33, 0.0 }
 0x377   :  { %996 = vadd.xlane.f32.xlu1 %v995_v63 }
 0x3d6   :  { %v1135_v48 = vpop.xlane.xlu1 %1134 }
 0x3d7   :  { %v1136_v21 = vsub.f32 %v1128_v18, %v1135_v48 }
 0x3d9   :  { %v1137_v58 = vmul.f32 1.442695, %v1136_v21 }
 0x3db   :  { %1613 = vpow2.f32 %v1137_v58 }
 0x3e8   :  { %v1614_v20 = vpop.eup %1613 }
 0x3e9   :  { %v1139_v37 = vsel %vm987_vm0, %v1614_v20, 0.0 }
 0x3ea   :  { %1140 = vadd.xlane.f32.xlu1 %v1139_v37 }
 0x400   :  { %v997_v36 = vpop.xlane.xlu1 %996 }
 0x401   :  { %1615 = vlog2.f32 %v997_v36 }
 0x40e   :  { %v1616_v14 = vpop.eup %1615 }
 0x40f   :  { %v999_v38 = vmul.f32 0.6931472, %v1616_v14 }
 0x411   :  { %v1000_v10 = vsub.f32 %v992_v15, %v999_v38 }
 0x413   :  { %v1001_v25 = vmul.f32 1.442695, %v1000_v10  ;;  %v1004_v52 = vmul.f32 %v1003_v27, %v1000_v10 }
 0x415   :  { %1617 = vpow2.f32 %v1001_v25  ;;  %v1005_v39 = vsel %vm987_vm0, %v1004_v52, 0.0 }
 0x416   :  { %1006 = vadd.xlane.f32.xlu1 %v1005_v39 }
 0x422   :  { %v1618_v41 = vpop.eup %1617 }
 0x423   :  { %v1023_v17 = vsub.f32 0.0, %v1618_v41 }
 0x425   :  { %v1024_v55 = vmul.f32 %v1023_v17, %v1000_v10 }
 0x427   :  { %v1025_v31 = vsel %vm987_vm0, %v1024_v55, 0.0 }
 0x428   :  { %1026 = vadd.xlane.f32.xlu1 %v1025_v31 }
 0x473   :  { %v1141_v42 = vpop.xlane.xlu1 %1140 }
 0x474   :  { %1619 = vlog2.f32 %v1141_v42 }
 0x481   :  { %v1620_v8 = vpop.eup %1619 }
 0x482   :  { %v1143_v3 = vmul.f32 0.6931472, %v1620_v8 }
 0x484   :  { %v1144_v61 = vsub.f32 %v1136_v21, %v1143_v3 }
 0x486   :  { %v1145_v45 = vmul.f32 1.442695, %v1144_v61  ;;  %v1147_v2 = vmul.f32 %v1144_v61, %v1003_v27 }
 0x488   :  { %1621 = vpow2.f32 %v1145_v45  ;;  %v1148_v0 = vsel %vm987_vm0, %v1147_v2, 0.0 }
 0x489   :  { %1149 = vadd.xlane.f32.xlu1 %v1148_v0 }
 0x495   :  { %v1622_v34 = vpop.eup %1621 }
 0x496   :  { %v1165_v50 = vsub.f32 0.0, %v1622_v34  ;;  %v1185_v53 = vadd.f32 %v1622_v34, %v1618_v41 }
 0x498   :  { %v1166_v11 = vmul.f32 %v1165_v50, %v1144_v61  ;;  %v1188_v19 = vmul.f32 0.5, %v1185_v53 }
 0x49a   :  { %v1167_v5 = vsel %vm987_vm0, %v1166_v11, 0.0  ;;  %1623 = vlog2.f32 %v1188_v19  ;;  %v1189_v40 = vsub.f32 0.0, %v1188_v19 }
 0x49b   :  { %1168 = vadd.xlane.f32.xlu1 %v1167_v5 }
 0x49f   :  { %v1007_v62 = vpop.xlane.xlu1 %1006 }
 0x4a0   :  { %v1009_v12 = vsel %vm1008_vm1, %v1007_v62, 0.0 }
 0x4a7   :  { %v1624_v22 = vpop.eup %1623 }
 0x4a8   :  { %v1191_v23 = vmul.f32 0.6931472, %v1624_v22 }
 0x4aa   :  { %v1192_v43 = vmul.f32 %v1191_v23, %v1189_v40 }
 0x4ac   :  { %v1193_v49 = vsel %vm987_vm0, %v1192_v43, 0.0 }
 0x4ad   :  { %1194 = vadd.xlane.f32.xlu1 %v1193_v49 }
 0x4b1   :  { %1010 = vadd.xlane.f32.xlu1 %v1009_v12  ;;  %v1027_v56 = vpop.xlane.xlu1 %1026 }
 0x4b2   :  { %v1028_v16 = vsel %vm1008_vm1, %v1027_v56, 0.0 }
 0x4b3   :  { %1029 = vadd.xlane.f32.xlu0 %v1028_v16 }
 0x512   :  { %v1150_v7 = vpop.xlane.xlu1 %1149 }
 0x513   :  { %v1151_v24 = vsel %vm1008_vm1, %v1150_v7, 0.0 }
 0x514   :  { %1152 = vadd.xlane.f32.xlu1 %v1151_v24 }
 0x524   :  { %v1169_v9 = vpop.xlane.xlu1 %1168 }
 0x525   :  { %v1170_v28 = vsel %vm1008_vm1, %v1169_v9, 0.0 }
 0x526   :  { %1171 = vadd.xlane.f32.xlu0 %v1170_v28 }
 0x536   :  { %v1195_v26 = vpop.xlane.xlu1 %1194 }
 0x537   :  { %v1196_v54 = vsel %vm1008_vm1, %v1195_v26, 0.0 }
 0x538   :  { %1197 = vadd.xlane.f32.xlu1 %v1196_v54 }
 0x53a   :  { %v1011_v44 = vpop.xlane.xlu1 %1010 }
 0x53b   :  { %v1012_v57 = vrot.slane %v1011_v44, 4 }
 0x53c   :  { %v1030_v4 = vpop.xlane.xlu0 %1029 }
 0x53d   :  { %v1013_v30 = vadd.f32 %v1012_v57, %v1011_v44  ;;  %v1031_v47 = vrot.slane %v1030_v4, 4 }
 0x53f   :  { %v1014_v13 = vrot.slane %v1013_v30, 2  ;;  %v1032_v51 = vadd.f32 %v1031_v47, %v1030_v4 }
 0x541   :  { %v1033_v59 = vrot.slane %v1032_v51, 2  ;;  %v1015_v18 = vadd.f32 %v1014_v13, %v1013_v30 }
 0x543   :  { %v1016_v35 = vrot.slane %v1015_v18, 1  ;;  %v1034_v60 = vadd.f32 %v1033_v59, %v1032_v51 }
 0x545   :  { %v1017_v46 = vadd.f32 %v1016_v35, %v1015_v18  ;;  %v1035_v32 = vrot.slane %v1034_v60, 1 }
 0x547   :  { %1557 = vpush %v1017_v46  ;;  %v1036_v1 = vadd.f32 %v1035_v32, %v1034_v60 }
 0x549   :  { %1559 = vpush %v1036_v1 }
 0x54a   :  { %1636 = shalt.err (!%p1633_p4)
}
 0x54b   :  { %s1689_s2 = smov 32   ;;  %s1690_s29 = smov 2  }
 0x54c   :  { %1227 = dma.vmem_to_hbm [thread:$0]  %s1222_s26, 64, %s2149_s6, [#allocation3], %s1689_s2, %s1689_s2, %s1690_s29  }
 0x54d   :  { %s1645_s10 = scalar_lea.vmem %s1235_s0, 32  ;;  %p1650_p6 = scmp.lt.s32.totalorder %s1235_s0, %s1235_s0 }
 0x54e   :  { %p1646_p5 = scmp.ne.s32.totalorder %s1235_s0, %s1645_s10  ;;  %p1651_p7 = scmp.lt.s32.totalorder %s1645_s10, %s1645_s10 }
 0x550   :  { %p1652_p8 = por %p1651_p7, %p1650_p6 }
 0x552   :  { %p1653_p9 = pnand %p1652_p8, %p1646_p5 }
 0x554   :  { %1656 = shalt.err (!%p1653_p9)
}
 0x555   :  { %1237 = dma.vmem_to_hbm [thread:$0]  %s1235_s0, 32, %s2150_s7, [#allocation6]  }
 0x556   :  { %s1244_s24 = sshll.u32 %s2151_s8, 4  ;;  %s1245_s24 = int_to_ptr.vmem [resolvable:$true] %s1244_s24 }
 0x557   :  { %s1665_s5 = scalar_lea.vmem %s1245_s24, 16  ;;  %p1670_p11 = scmp.lt.s32.totalorder %s1245_s24, %s1245_s24 }
 0x558   :  { %p1666_p10 = scmp.ne.s32.totalorder %s1245_s24, %s1665_s5  ;;  %p1671_p12 = scmp.lt.s32.totalorder %s1665_s5, %s1665_s5 }
 0x55a   :  { %p1672_p13 = por %p1671_p12, %p1670_p11 }
 0x55c   :  { %p1673_p0 = pnand %p1672_p13, %p1666_p10 }
 0x578   :  { %s1558_s6 = spop %1557 }
 0x579   :  { %s1021_s13 = smul.f32 0.5, %s1558_s6 }
 0x57a   :  { %s1560_s7 = spop %1559 }
 0x57b   :  { %s1040_s18 = smul.f32 0.5, %s1560_s7 }
 0x59d   :  { %v1153_v15 = vpop.xlane.xlu1 %1152 }
 0x59e   :  { %v1154_v29 = vrot.slane %v1153_v15, 4 }
 0x5a0   :  { %v1155_v33 = vadd.f32 %v1154_v29, %v1153_v15 }
 0x5a2   :  { %v1156_v63 = vrot.slane %v1155_v33, 2 }
 0x5a4   :  { %v1157_v48 = vadd.f32 %v1156_v63, %v1155_v33 }
 0x5a6   :  { %v1158_v21 = vrot.slane %v1157_v48, 1 }
 0x5a8   :  { %v1159_v58 = vadd.f32 %v1158_v21, %v1157_v48 }
 0x5aa   :  { %1561 = vpush %v1159_v58 }
 0x5af   :  { %v1172_v20 = vpop.xlane.xlu0 %1171 }
 0x5b0   :  { %v1173_v37 = vrot.slane %v1172_v20, 4 }
 0x5b2   :  { %v1174_v36 = vadd.f32 %v1173_v37, %v1172_v20 }
 0x5b4   :  { %v1175_v6 = vrot.slane %v1174_v36, 2 }
 0x5b6   :  { %v1176_v14 = vadd.f32 %v1175_v6, %v1174_v36 }
 0x5b8   :  { %v1177_v38 = vrot.slane %v1176_v14, 1 }
 0x5ba   :  { %v1178_v27 = vadd.f32 %v1177_v38, %v1176_v14 }
 0x5bc   :  { %1563 = vpush %v1178_v27 }
 0x5c1   :  { %v1198_v10 = vpop.xlane.xlu1 %1197 }
 0x5c2   :  { %v1199_v25 = vrot.slane %v1198_v10, 4 }
 0x5c4   :  { %v1200_v52 = vadd.f32 %v1199_v25, %v1198_v10 }
 0x5c6   :  { %v1201_v39 = vrot.slane %v1200_v52, 2 }
 0x5c8   :  { %v1202_v41 = vadd.f32 %v1201_v39, %v1200_v52 }
 0x5ca   :  { %v1203_v17 = vrot.slane %v1202_v41, 1 }
 0x5cc   :  { %v1204_v55 = vadd.f32 %v1203_v17, %v1202_v41 }
 0x5ce   :  { %1565 = vpush %v1204_v55 }
 0x5db   :  { %s1562_s14 = spop %1561 }
 0x5dc   :  { %s1163_s15 = smul.f32 0.5, %s1562_s14 }
 0x5de   :  { %s1164_s16 = sadd.f32 %s1163_s15, %s1021_s13 }
 0x5e0   :  { %1211 = sst [smem:[#allocation7]] %s1164_s16 }
 0x5ed   :  { %s1564_s1 = spop %1563 }
 0x5ee   :  { %s1182_s17 = smul.f32 0.5, %s1564_s1 }
 0x5f0   :  { %s1183_s19 = sadd.f32 %s1182_s17, %s1040_s18 }
 0x5f2   :  { %s1209_s20 = smul.f32 0.5, %s1183_s19 }
 0x5ff   :  { %s1566_s21 = spop %1565 }
 0x600   :  { %s1208_s22 = smul.f32 0.5, %s1566_s21 }
 0x602   :  { %s1212_s4 = ssub.f32 %s1208_s22, %s1209_s20 }
 0x604   :  { %s1213_s25 = smul.f32 0.5, %s1212_s4 }
 0x606   :  { %1215 = sst [smem:[#allocation7 + $0x1]] %s1213_s25 }
 0x607   :  { %1676 = shalt.err (!%p1673_p0)
}
 0x608   :  { %s1691_s26 = smov [#allocation7]  }
 0x609   :  { %1247 = dma.smem_to_vmem %s1691_s26, 16, %s1245_s24, [#allocation4]  }
 0x60a   :  { %1677 = dma.done.wait [#allocation3], 64  }
 0x60b   :  { %1678 = vsyncadd [#allocation3], 4294967232 }
 0x60c   :  { %1679 = dma.done.wait [#allocation6], 32  }
 0x60d   :  { %1680 = vsyncadd [#allocation6], 4294967264 }
 0x60e   :  { %1681 = dma.done.wait [#allocation4], 16  }
 0x60f   :  { %1682 = vsyncadd [#allocation4], 4294967280 }
 0x610   :  { %1257 = sfence }
 0x611   :  { %1258 = vsyncpa [#allocation3], 1 }
 0x612   :  { %1259 = vsyncpa [#allocation6], 1 }
 0x613   :  { %1260 = vsyncpa [#allocation4], 1 }

</bundles_post_ra>
